<compile_context>
chip_gen: v5e
topology: v5e:2x2
jax: 0.10.0
libtpu: 0.0.40
codegen_flags: <defaults>
</compile_context>

<pallas_src>
import jax
import jax.numpy as jnp
from jax.experimental import pallas as pl
from jax.experimental.pallas import tpu as pltpu


# ----------------------------------------------------------------------------
# Optimized 2-layer kernel: wavefront-interleaved, fused block matmul,
# everything in vregs, per-step lane-dense output writes.
# ----------------------------------------------------------------------------
def _make_rnn2_kernel(seq, batch, hidden):
    H = hidden

    def kernel(x_ref, h0_ref, w_inp_ref, b12_ref, w_blk_ref,
               lin_w_ref, lin_b_ref, out_ref):
        # Batched input projection (+ both biases) for all seq+1 wave steps:
        # a single MXU matmul, off the serial chain.  Shape ((seq+1)*batch, 2H):
        #   columns [:H]  = x_t @ W_ih1 + b_ih1 + b_hh1
        #   columns [H:]  = b_ih2 + b_hh2         (broadcast)
        addterm = (jnp.dot(x_ref[...], w_inp_ref[...],
                           preferred_element_type=jnp.float32) + b12_ref[...])
        w_blk = w_blk_ref[...]          # (2H, 2H) fused recurrence weight
        lin_w = lin_w_ref[...]          # (2H, n_pad), top H rows are zero
        lin_b = lin_b_ref[...]          # (1, n_pad)

        col = jax.lax.broadcasted_iota(jnp.int32, (batch, 2 * H), 1)

        # --- Wave step 0: advance layer-1 only; layer-2 state stays at h0[1].
        h12 = h0_ref[...]                                      # [h1[-1] | h2[-1]]
        g = (jnp.dot(h12, w_blk, preferred_element_type=jnp.float32)
             + addterm[0:batch, :])
        h12 = jnp.where(col < H, jnp.tanh(g), h12)             # [h1[0] | h2[-1]]

        # --- Wavefront steps s = 1..seq: ONE fused (batch,2H)@(2H,2H) matmul per
        # step on the serial chain; Linear+ReLU is independent MXU filler.
        #   h12 -> [h1[s] | h2[s-1]];  output[s-1] = relu(h2[s-1] @ W_lin + b_lin)
        for s in range(1, seq + 1):
            pre = (jnp.dot(h12, w_blk, preferred_element_type=jnp.float32)
                   + addterm[s * batch:(s + 1) * batch, :])
            h12 = jnp.tanh(pre)
            z = (jnp.dot(h12, lin_w, preferred_element_type=jnp.float32)
                 + lin_b)
            out_ref[pl.ds((s - 1) * batch, batch), :] = (
                jnp.maximum(z, 0.0).astype(out_ref.dtype))

    return kernel


# ----------------------------------------------------------------------------
# Generic fallback kernel (n_layers != 2): sequential layers, state in vregs,
# only the per-layer output slab is staged in VMEM scratch.
# ----------------------------------------------------------------------------
def _make_generic_kernel(seq, batch, hidden, n_layers):
    def kernel(*refs):
        x2d_ref = refs[0]
        layer_refs = refs[1:1 + 4 * n_layers]
        lin_w_ref = refs[1 + 4 * n_layers]
        lin_b_ref = refs[2 + 4 * n_layers]
        out_ref = refs[3 + 4 * n_layers]
        y_scr = refs[4 + 4 * n_layers]      # (seq*batch, hidden) layer-output staging

        layer_in = x2d_ref[...]
        for l in range(n_layers):
            h0_ref, w_ih_ref, w_hh_ref, b_ref = layer_refs[4 * l:4 * l + 4]
            # Batched input projection as a value (kept in vregs).
            xp = (jnp.dot(layer_in, w_ih_ref[...],
                          preferred_element_type=jnp.float32) + b_ref[...])
            w_hh = w_hh_ref[...]
            h = h0_ref[...]
            for t in range(seq):
                h = jnp.tanh(xp[t * batch:(t + 1) * batch, :] +
                             jnp.dot(h, w_hh, preferred_element_type=jnp.float32))
                y_scr[pl.ds(t * batch, batch), :] = h
            layer_in = y_scr[...]

        z = (jnp.dot(layer_in, lin_w_ref[...],
                     preferred_element_type=jnp.float32) + lin_b_ref[...])
        out_ref[...] = jnp.maximum(z, 0.0).astype(out_ref.dtype)

    return kernel


# ----------------------------------------------------------------------------
# Full Network forward
# ----------------------------------------------------------------------------
def network_forward(x, h0, params):
    """x: (seq, batch, input_size); h0: (n_layers, batch, hidden)."""
    seq, batch, in_dim = x.shape
    rnn_params = params["rnn"]
    n_layers = len(rnn_params)
    hidden = rnn_params[0][1].shape[0]
    n_letters = params["lin_w"].shape[1]
    n_pad = ((n_letters + 127) // 128) * 128

    vmem = pl.BlockSpec(memory_space=pltpu.MemorySpace.VMEM)
    lin_b_pad = jnp.zeros((1, n_pad), jnp.float32).at[:, :n_letters].set(params["lin_b"])

    if n_layers == 2:
        (w_ih1, w_hh1, b1), (w_ih2, w_hh2, b2) = rnn_params
        H = hidden

        # Fused block recurrence weight: [h1 | h2] @ [[W_hh1, W_ih2],[0, W_hh2]].
        w_blk = jnp.zeros((2 * H, 2 * H), jnp.float32)
        w_blk = w_blk.at[:H, :H].set(w_hh1).at[:H, H:].set(w_ih2).at[H:, H:].set(w_hh2)

        # Input projection into the 2H-wide wavefront layout: [W_ih1 | 0], [b1 | b2].
        w_inp = jnp.zeros((in_dim, 2 * H), jnp.float32).at[:, :H].set(w_ih1)
        b12 = jnp.concatenate([b1, b2], axis=-1)              # (1, 2H)

        # Linear acts only on the layer-2 half of the state; lane-dense columns.
        lin_w_blk = (jnp.zeros((2 * H, n_pad), jnp.float32)
                     .at[H:, :n_letters].set(params["lin_w"]))

        # One extra zero timestep feeds the trailing wave step (its layer-1 half
        # is discarded inside the kernel).
        x2d = (jnp.zeros(((seq + 1) * batch, in_dim), jnp.float32)
               .at[:seq * batch].set(x.reshape(seq * batch, in_dim)))
        h0_cat = jnp.concatenate([h0[0], h0[1]], axis=-1)      # (batch, 2H)

        kernel = _make_rnn2_kernel(seq, batch, hidden)
        out2d = pl.pallas_call(
            kernel,
            out_shape=jax.ShapeDtypeStruct((seq * batch, n_pad), jnp.float32),
            in_specs=[vmem] * 7,
            out_specs=vmem,
        )(x2d, h0_cat, w_inp, b12, w_blk, lin_w_blk, lin_b_pad)
    else:
        # Generic layer count (not the optimized wavefront path).
        lin_w_pad = (jnp.zeros((hidden, n_pad), jnp.float32)
                     .at[:, :n_letters].set(params["lin_w"]))
        x2d = x.reshape(seq * batch, in_dim)
        flat_inputs = [x2d]
        for l, (w_ih, w_hh, b) in enumerate(rnn_params):
            flat_inputs += [h0[l], w_ih, w_hh, b]
        flat_inputs += [lin_w_pad, lin_b_pad]

        kernel = _make_generic_kernel(seq, batch, hidden, n_layers)
        out2d = pl.pallas_call(
            kernel,
            out_shape=jax.ShapeDtypeStruct((seq * batch, n_pad), jnp.float32),
            in_specs=[vmem] * len(flat_inputs),
            out_specs=vmem,
            scratch_shapes=[pltpu.VMEM((seq * batch, hidden), jnp.float32)],
        )(*flat_inputs)

    return out2d[:, :n_letters].reshape(seq, batch, n_letters)


# ----------------------------------------------------------------------------
# Pure-JAX reference (for correctness check only)
# ----------------------------------------------------------------------------
def network_ref(x, h0, params):
    layer_in = x
    for l, (w_ih, w_hh, b) in enumerate(params["rnn"]):
        h = h0[l]
        outs = []
        for t in range(x.shape[0]):
            h = jnp.tanh(layer_in[t] @ w_ih + h @ w_hh + b)
            outs.append(h)
        layer_in = jnp.stack(outs, axis=0)
    z = layer_in @ params["lin_w"] + params["lin_b"]
    return jnp.maximum(z, 0.0)


def init_params(key, input_size, hidden_size, n_layers, n_letters):
    """Deterministic PyTorch-like init: U(-1/sqrt(hidden), 1/sqrt(hidden))."""
    params = {"rnn": []}
    bound = 1.0 / jnp.sqrt(jnp.float32(hidden_size))
    for l in range(n_layers):
        in_dim = input_size if l == 0 else hidden_size
        key, k1, k2, k3, k4 = jax.random.split(key, 5)
        w_ih = jax.random.uniform(k1, (in_dim, hidden_size), jnp.float32, -bound, bound)
        w_hh = jax.random.uniform(k2, (hidden_size, hidden_size), jnp.float32, -bound, bound)
        b_ih = jax.random.uniform(k3, (hidden_size,), jnp.float32, -bound, bound)
        b_hh = jax.random.uniform(k4, (hidden_size,), jnp.float32, -bound, bound)
        params["rnn"].append((w_ih, w_hh, (b_ih + b_hh).reshape(1, hidden_size)))
    key, k1, k2 = jax.random.split(key, 3)
    lb = 1.0 / jnp.sqrt(jnp.float32(hidden_size))
    params["lin_w"] = jax.random.uniform(k1, (hidden_size, n_letters), jnp.float32, -lb, lb)
    params["lin_b"] = jax.random.uniform(k2, (1, n_letters), jnp.float32, -lb, lb)
    return params, key


if __name__ == "__main__":
    seq_len, batch_size = 8, 2
    input_size, hidden_size, n_layers = 16, 32, 2
    n_letters = 26

    key = jax.random.PRNGKey(0)
    params, key = init_params(key, input_size, hidden_size, n_layers, n_letters)

    key, kx, kh = jax.random.split(key, 3)
    x = jax.random.normal(kx, (seq_len, batch_size, input_size), jnp.float32)
    # init_hidden(): torch.randn(n_layers, batch, hidden) -- deterministic here
    h0 = jax.random.normal(kh, (n_layers, batch_size, hidden_size), jnp.float32)

    fwd = jax.jit(network_forward)
    out = fwd(x, h0, params)
    out = jax.block_until_ready(out)

    ref = network_ref(x, h0, params)
    assert out.shape == (seq_len, batch_size, n_letters), out.shape
    assert jnp.allclose(out, ref, atol=2e-3, rtol=2e-3), float(jnp.max(jnp.abs(out - ref)))

    print("KERNEL_OK")
</pallas_src>

<mosaic_0001>
module attributes {stable_mosaic.version = 11 : i64} {
  func.func @kernel(%arg0: memref<18x16xf32, #tpu.memory_space<vmem>>, %arg1: memref<2x64xf32, #tpu.memory_space<vmem>>, %arg2: memref<16x64xf32, #tpu.memory_space<vmem>>, %arg3: memref<1x64xf32, #tpu.memory_space<vmem>>, %arg4: memref<64x64xf32, #tpu.memory_space<vmem>>, %arg5: memref<64x128xf32, #tpu.memory_space<vmem>>, %arg6: memref<1x128xf32, #tpu.memory_space<vmem>>, %arg7: memref<16x128xf32, #tpu.memory_space<vmem>>) attributes {dimension_semantics = [], scalar_prefetch = 0 : i64, scratch_operands = 0 : i64, tpu.core_type = #tpu.core_type<tc>} {
    %c0 = arith.constant 0 : index
    %c0_0 = arith.constant 0 : index
    %0 = vector.load %arg0[%c0, %c0_0] : memref<18x16xf32, #tpu.memory_space<vmem>>, vector<18x16xf32>
    %c0_1 = arith.constant 0 : index
    %c0_2 = arith.constant 0 : index
    %1 = vector.load %arg2[%c0_1, %c0_2] : memref<16x64xf32, #tpu.memory_space<vmem>>, vector<16x64xf32>
    %cst = arith.constant dense<0.000000e+00> : vector<18x64xf32>
    %2 = tpu.matmul %0, %1, %cst {dimension_numbers = #tpu.dot_dimension_numbers<[1], [0], [0], [1], [0, 0, 1, 1], [], []>} : vector<18x16xf32>, vector<16x64xf32>, vector<18x64xf32> -> vector<18x64xf32>
    %c0_3 = arith.constant 0 : index
    %c0_4 = arith.constant 0 : index
    %3 = vector.load %arg3[%c0_3, %c0_4] : memref<1x64xf32, #tpu.memory_space<vmem>>, vector<1x64xf32>
    %4 = vector.broadcast %3 : vector<1x64xf32> to vector<18x64xf32>
    %5 = arith.addf %2, %4 : vector<18x64xf32>
    %c0_5 = arith.constant 0 : index
    %c0_6 = arith.constant 0 : index
    %6 = vector.load %arg4[%c0_5, %c0_6] : memref<64x64xf32, #tpu.memory_space<vmem>>, vector<64x64xf32>
    %c0_7 = arith.constant 0 : index
    %c0_8 = arith.constant 0 : index
    %7 = vector.load %arg5[%c0_7, %c0_8] : memref<64x128xf32, #tpu.memory_space<vmem>>, vector<64x128xf32>
    %c0_9 = arith.constant 0 : index
    %c0_10 = arith.constant 0 : index
    %8 = vector.load %arg6[%c0_9, %c0_10] : memref<1x128xf32, #tpu.memory_space<vmem>>, vector<1x128xf32>
    %9 = tpu.iota {dimensions = array<i32: 1>} : vector<2x64xi32>
    %c0_11 = arith.constant 0 : index
    %c0_12 = arith.constant 0 : index
    %10 = vector.load %arg1[%c0_11, %c0_12] : memref<2x64xf32, #tpu.memory_space<vmem>>, vector<2x64xf32>
    %cst_13 = arith.constant dense<0.000000e+00> : vector<2x64xf32>
    %11 = tpu.matmul %10, %6, %cst_13 {dimension_numbers = #tpu.dot_dimension_numbers<[1], [0], [0], [1], [0, 0, 1, 1], [], []>} : vector<2x64xf32>, vector<64x64xf32>, vector<2x64xf32> -> vector<2x64xf32>
    %12 = vector.extract_strided_slice %5 {offsets = [0, 0], sizes = [2, 64], strides = [1, 1]} : vector<18x64xf32> to vector<2x64xf32>
    %13 = arith.addf %11, %12 : vector<2x64xf32>
    %c32_i32 = arith.constant 32 : i32
    %14 = vector.broadcast %c32_i32 : i32 to vector<2x64xi32>
    %15 = arith.cmpi slt, %9, %14 : vector<2x64xi32>
    %16 = math.tanh %13 : vector<2x64xf32>
    %17 = arith.select %15, %16, %10 : vector<2x64xi1>, vector<2x64xf32>
    %cst_14 = arith.constant dense<0.000000e+00> : vector<2x64xf32>
    %18 = tpu.matmul %17, %6, %cst_14 {dimension_numbers = #tpu.dot_dimension_numbers<[1], [0], [0], [1], [0, 0, 1, 1], [], []>} : vector<2x64xf32>, vector<64x64xf32>, vector<2x64xf32> -> vector<2x64xf32>
    %19 = vector.extract_strided_slice %5 {offsets = [2, 0], sizes = [2, 64], strides = [1, 1]} : vector<18x64xf32> to vector<2x64xf32>
    %20 = arith.addf %18, %19 : vector<2x64xf32>
    %21 = math.tanh %20 : vector<2x64xf32>
    %cst_15 = arith.constant dense<0.000000e+00> : vector<2x128xf32>
    %22 = tpu.matmul %21, %7, %cst_15 {dimension_numbers = #tpu.dot_dimension_numbers<[1], [0], [0], [1], [0, 0, 1, 1], [], []>} : vector<2x64xf32>, vector<64x128xf32>, vector<2x128xf32> -> vector<2x128xf32>
    %23 = vector.broadcast %8 : vector<1x128xf32> to vector<2x128xf32>
    %24 = arith.addf %22, %23 : vector<2x128xf32>
    %cst_16 = arith.constant 0.000000e+00 : f32
    %25 = vector.broadcast %cst_16 : f32 to vector<2x128xf32>
    %26 = arith.maximumf %24, %25 : vector<2x128xf32>
    %c0_17 = arith.constant 0 : index
    %c0_18 = arith.constant 0 : index
    %27 = vector.load %arg7[%c0_17, %c0_18] : memref<16x128xf32, #tpu.memory_space<vmem>>, vector<2x128xf32>
    tpu.vector_store %arg7[%c0_17, %c0_18], %26 {strides = array<i32>} : memref<16x128xf32, #tpu.memory_space<vmem>>, vector<2x128xf32>,
    %cst_19 = arith.constant dense<0.000000e+00> : vector<2x64xf32>
    %28 = tpu.matmul %21, %6, %cst_19 {dimension_numbers = #tpu.dot_dimension_numbers<[1], [0], [0], [1], [0, 0, 1, 1], [], []>} : vector<2x64xf32>, vector<64x64xf32>, vector<2x64xf32> -> vector<2x64xf32>
    %29 = vector.extract_strided_slice %5 {offsets = [4, 0], sizes = [2, 64], strides = [1, 1]} : vector<18x64xf32> to vector<2x64xf32>
    %30 = arith.addf %28, %29 : vector<2x64xf32>
    %31 = math.tanh %30 : vector<2x64xf32>
    %cst_20 = arith.constant dense<0.000000e+00> : vector<2x128xf32>
    %32 = tpu.matmul %31, %7, %cst_20 {dimension_numbers = #tpu.dot_dimension_numbers<[1], [0], [0], [1], [0, 0, 1, 1], [], []>} : vector<2x64xf32>, vector<64x128xf32>, vector<2x128xf32> -> vector<2x128xf32>
    %33 = vector.broadcast %8 : vector<1x128xf32> to vector<2x128xf32>
    %34 = arith.addf %32, %33 : vector<2x128xf32>
    %cst_21 = arith.constant 0.000000e+00 : f32
    %35 = vector.broadcast %cst_21 : f32 to vector<2x128xf32>
    %36 = arith.maximumf %34, %35 : vector<2x128xf32>
    %c2 = arith.constant 2 : index
    %c0_22 = arith.constant 0 : index
    %37 = vector.load %arg7[%c2, %c0_22] : memref<16x128xf32, #tpu.memory_space<vmem>>, vector<2x128xf32>
    tpu.vector_store %arg7[%c2, %c0_22], %36 {strides = array<i32>} : memref<16x128xf32, #tpu.memory_space<vmem>>, vector<2x128xf32>,
    %cst_23 = arith.constant dense<0.000000e+00> : vector<2x64xf32>
    %38 = tpu.matmul %31, %6, %cst_23 {dimension_numbers = #tpu.dot_dimension_numbers<[1], [0], [0], [1], [0, 0, 1, 1], [], []>} : vector<2x64xf32>, vector<64x64xf32>, vector<2x64xf32> -> vector<2x64xf32>
    %39 = vector.extract_strided_slice %5 {offsets = [6, 0], sizes = [2, 64], strides = [1, 1]} : vector<18x64xf32> to vector<2x64xf32>
    %40 = arith.addf %38, %39 : vector<2x64xf32>
    %41 = math.tanh %40 : vector<2x64xf32>
    %cst_24 = arith.constant dense<0.000000e+00> : vector<2x128xf32>
    %42 = tpu.matmul %41, %7, %cst_24 {dimension_numbers = #tpu.dot_dimension_numbers<[1], [0], [0], [1], [0, 0, 1, 1], [], []>} : vector<2x64xf32>, vector<64x128xf32>, vector<2x128xf32> -> vector<2x128xf32>
    %43 = vector.broadcast %8 : vector<1x128xf32> to vector<2x128xf32>
    %44 = arith.addf %42, %43 : vector<2x128xf32>
    %cst_25 = arith.constant 0.000000e+00 : f32
    %45 = vector.broadcast %cst_25 : f32 to vector<2x128xf32>
    %46 = arith.maximumf %44, %45 : vector<2x128xf32>
    %c4 = arith.constant 4 : index
    %c0_26 = arith.constant 0 : index
    %47 = vector.load %arg7[%c4, %c0_26] : memref<16x128xf32, #tpu.memory_space<vmem>>, vector<2x128xf32>
    tpu.vector_store %arg7[%c4, %c0_26], %46 {strides = array<i32>} : memref<16x128xf32, #tpu.memory_space<vmem>>, vector<2x128xf32>,
    %cst_27 = arith.constant dense<0.000000e+00> : vector<2x64xf32>
    %48 = tpu.matmul %41, %6, %cst_27 {dimension_numbers = #tpu.dot_dimension_numbers<[1], [0], [0], [1], [0, 0, 1, 1], [], []>} : vector<2x64xf32>, vector<64x64xf32>, vector<2x64xf32> -> vector<2x64xf32>
    %49 = vector.extract_strided_slice %5 {offsets = [8, 0], sizes = [2, 64], strides = [1, 1]} : vector<18x64xf32> to vector<2x64xf32>
    %50 = arith.addf %48, %49 : vector<2x64xf32>
    %51 = math.tanh %50 : vector<2x64xf32>
    %cst_28 = arith.constant dense<0.000000e+00> : vector<2x128xf32>
    %52 = tpu.matmul %51, %7, %cst_28 {dimension_numbers = #tpu.dot_dimension_numbers<[1], [0], [0], [1], [0, 0, 1, 1], [], []>} : vector<2x64xf32>, vector<64x128xf32>, vector<2x128xf32> -> vector<2x128xf32>
    %53 = vector.broadcast %8 : vector<1x128xf32> to vector<2x128xf32>
    %54 = arith.addf %52, %53 : vector<2x128xf32>
    %cst_29 = arith.constant 0.000000e+00 : f32
    %55 = vector.broadcast %cst_29 : f32 to vector<2x128xf32>
    %56 = arith.maximumf %54, %55 : vector<2x128xf32>
    %c6 = arith.constant 6 : index
    %c0_30 = arith.constant 0 : index
    %57 = vector.load %arg7[%c6, %c0_30] : memref<16x128xf32, #tpu.memory_space<vmem>>, vector<2x128xf32>
    tpu.vector_store %arg7[%c6, %c0_30], %56 {strides = array<i32>} : memref<16x128xf32, #tpu.memory_space<vmem>>, vector<2x128xf32>,
    %cst_31 = arith.constant dense<0.000000e+00> : vector<2x64xf32>
    %58 = tpu.matmul %51, %6, %cst_31 {dimension_numbers = #tpu.dot_dimension_numbers<[1], [0], [0], [1], [0, 0, 1, 1], [], []>} : vector<2x64xf32>, vector<64x64xf32>, vector<2x64xf32> -> vector<2x64xf32>
    %59 = vector.extract_strided_slice %5 {offsets = [10, 0], sizes = [2, 64], strides = [1, 1]} : vector<18x64xf32> to vector<2x64xf32>
    %60 = arith.addf %58, %59 : vector<2x64xf32>
    %61 = math.tanh %60 : vector<2x64xf32>
    %cst_32 = arith.constant dense<0.000000e+00> : vector<2x128xf32>
    %62 = tpu.matmul %61, %7, %cst_32 {dimension_numbers = #tpu.dot_dimension_numbers<[1], [0], [0], [1], [0, 0, 1, 1], [], []>} : vector<2x64xf32>, vector<64x128xf32>, vector<2x128xf32> -> vector<2x128xf32>
    %63 = vector.broadcast %8 : vector<1x128xf32> to vector<2x128xf32>
    %64 = arith.addf %62, %63 : vector<2x128xf32>
    %cst_33 = arith.constant 0.000000e+00 : f32
    %65 = vector.broadcast %cst_33 : f32 to vector<2x128xf32>
    %66 = arith.maximumf %64, %65 : vector<2x128xf32>
    %c8 = arith.constant 8 : index
    %c0_34 = arith.constant 0 : index
    %67 = vector.load %arg7[%c8, %c0_34] : memref<16x128xf32, #tpu.memory_space<vmem>>, vector<2x128xf32>
    tpu.vector_store %arg7[%c8, %c0_34], %66 {strides = array<i32>} : memref<16x128xf32, #tpu.memory_space<vmem>>, vector<2x128xf32>,
    %cst_35 = arith.constant dense<0.000000e+00> : vector<2x64xf32>
    %68 = tpu.matmul %61, %6, %cst_35 {dimension_numbers = #tpu.dot_dimension_numbers<[1], [0], [0], [1], [0, 0, 1, 1], [], []>} : vector<2x64xf32>, vector<64x64xf32>, vector<2x64xf32> -> vector<2x64xf32>
    %69 = vector.extract_strided_slice %5 {offsets = [12, 0], sizes = [2, 64], strides = [1, 1]} : vector<18x64xf32> to vector<2x64xf32>
    %70 = arith.addf %68, %69 : vector<2x64xf32>
    %71 = math.tanh %70 : vector<2x64xf32>
    %cst_36 = arith.constant dense<0.000000e+00> : vector<2x128xf32>
    %72 = tpu.matmul %71, %7, %cst_36 {dimension_numbers = #tpu.dot_dimension_numbers<[1], [0], [0], [1], [0, 0, 1, 1], [], []>} : vector<2x64xf32>, vector<64x128xf32>, vector<2x128xf32> -> vector<2x128xf32>
    %73 = vector.broadcast %8 : vector<1x128xf32> to vector<2x128xf32>
    %74 = arith.addf %72, %73 : vector<2x128xf32>
    %cst_37 = arith.constant 0.000000e+00 : f32
    %75 = vector.broadcast %cst_37 : f32 to vector<2x128xf32>
    %76 = arith.maximumf %74, %75 : vector<2x128xf32>
    %c10 = arith.constant 10 : index
    %c0_38 = arith.constant 0 : index
    %77 = vector.load %arg7[%c10, %c0_38] : memref<16x128xf32, #tpu.memory_space<vmem>>, vector<2x128xf32>
    tpu.vector_store %arg7[%c10, %c0_38], %76 {strides = array<i32>} : memref<16x128xf32, #tpu.memory_space<vmem>>, vector<2x128xf32>,
    %cst_39 = arith.constant dense<0.000000e+00> : vector<2x64xf32>
    %78 = tpu.matmul %71, %6, %cst_39 {dimension_numbers = #tpu.dot_dimension_numbers<[1], [0], [0], [1], [0, 0, 1, 1], [], []>} : vector<2x64xf32>, vector<64x64xf32>, vector<2x64xf32> -> vector<2x64xf32>
    %79 = vector.extract_strided_slice %5 {offsets = [14, 0], sizes = [2, 64], strides = [1, 1]} : vector<18x64xf32> to vector<2x64xf32>
    %80 = arith.addf %78, %79 : vector<2x64xf32>
    %81 = math.tanh %80 : vector<2x64xf32>
    %cst_40 = arith.constant dense<0.000000e+00> : vector<2x128xf32>
    %82 = tpu.matmul %81, %7, %cst_40 {dimension_numbers = #tpu.dot_dimension_numbers<[1], [0], [0], [1], [0, 0, 1, 1], [], []>} : vector<2x64xf32>, vector<64x128xf32>, vector<2x128xf32> -> vector<2x128xf32>
    %83 = vector.broadcast %8 : vector<1x128xf32> to vector<2x128xf32>
    %84 = arith.addf %82, %83 : vector<2x128xf32>
    %cst_41 = arith.constant 0.000000e+00 : f32
    %85 = vector.broadcast %cst_41 : f32 to vector<2x128xf32>
    %86 = arith.maximumf %84, %85 : vector<2x128xf32>
    %c12 = arith.constant 12 : index
    %c0_42 = arith.constant 0 : index
    %87 = vector.load %arg7[%c12, %c0_42] : memref<16x128xf32, #tpu.memory_space<vmem>>, vector<2x128xf32>
    tpu.vector_store %arg7[%c12, %c0_42], %86 {strides = array<i32>} : memref<16x128xf32, #tpu.memory_space<vmem>>, vector<2x128xf32>,
    %cst_43 = arith.constant dense<0.000000e+00> : vector<2x64xf32>
    %88 = tpu.matmul %81, %6, %cst_43 {dimension_numbers = #tpu.dot_dimension_numbers<[1], [0], [0], [1], [0, 0, 1, 1], [], []>} : vector<2x64xf32>, vector<64x64xf32>, vector<2x64xf32> -> vector<2x64xf32>
    %89 = vector.extract_strided_slice %5 {offsets = [16, 0], sizes = [2, 64], strides = [1, 1]} : vector<18x64xf32> to vector<2x64xf32>
    %90 = arith.addf %88, %89 : vector<2x64xf32>
    %91 = math.tanh %90 : vector<2x64xf32>
    %cst_44 = arith.constant dense<0.000000e+00> : vector<2x128xf32>
    %92 = tpu.matmul %91, %7, %cst_44 {dimension_numbers = #tpu.dot_dimension_numbers<[1], [0], [0], [1], [0, 0, 1, 1], [], []>} : vector<2x64xf32>, vector<64x128xf32>, vector<2x128xf32> -> vector<2x128xf32>
    %93 = vector.broadcast %8 : vector<1x128xf32> to vector<2x128xf32>
    %94 = arith.addf %92, %93 : vector<2x128xf32>
    %cst_45 = arith.constant 0.000000e+00 : f32
    %95 = vector.broadcast %cst_45 : f32 to vector<2x128xf32>
    %96 = arith.maximumf %94, %95 : vector<2x128xf32>
    %c14 = arith.constant 14 : index
    %c0_46 = arith.constant 0 : index
    %97 = vector.load %arg7[%c14, %c0_46] : memref<16x128xf32, #tpu.memory_space<vmem>>, vector<2x128xf32>
    tpu.vector_store %arg7[%c14, %c0_46], %96 {strides = array<i32>} : memref<16x128xf32, #tpu.memory_space<vmem>>, vector<2x128xf32>,
    return
  }
}

</mosaic_0001>

<bundles_post_ra>
// kernel: network_forward.1
= control target key start
LH: loop header
LB: loop body
LE: loop exit
PB: predicated region body
PF: predicated region fallthrough
CT: control target
= control target key end

     0   :  { %vm36_vm0 = vcmask 130048   ;;  %s924_s0 = inlined_call_operand.vmem [shape: f32[18,16], index: 0, kind: input, shape index: {}]   ;;  %s925_s1 = inlined_call_operand.vmem [shape: f32[2,64], index: 1, kind: input, shape index: {}]   ;;  %s926_s2 = inlined_call_operand.vmem [shape: f32[16,64], index: 2, kind: input, shape index: {}]   ;;  %s927_s3 = inlined_call_operand.vmem [shape: f32[1,64], index: 3, kind: input, shape index: {}]   ;;  %s928_s4 = inlined_call_operand.vmem [shape: f32[64,64], index: 4, kind: input, shape index: {}]   ;;  %s929_s5 = inlined_call_operand.vmem [shape: f32[64,128], index: 5, kind: input, shape index: {}]   ;;  %s930_s6 = inlined_call_operand.vmem [shape: f32[1,128], index: 6, kind: input, shape index: {}]   ;;  %s931_s7 = inlined_call_operand.hbm [shape: f32[16,128], index: 7, kind: output, shape index: {}]  }
   0x1   :  { %v640_v0 = vld [vmem:[%s928_s4 + $0x38] sm:$0xff]  ;;  %v645_v1 = vld [vmem:[%s928_s4 + $0x30] sm:$0xff]  ;;  %v31_v2 = vld [vmem:[%s926_s2 + $0x8] sm:$0xff] }
   0x2   :  { %104 = vmatpush.msra.mxu1 %v640_v0  ;;  %133 = vmatpush.msra.mxu2 %v640_v0  ;;  %v655_v3 = vld [vmem:[%s928_s4 + $0x28] sm:$0xff]  ;;  %v30_v4 = vld [vmem:[%s926_s2] sm:$0xff] }
   0x3   :  { %60 = vmatpush.msra.mxu0 %v31_v2  ;;  %v27_v5 = vld [vmem:[%s924_s0] sm:$0xff] }
   0x4   :  { %105 = vmatpush.msra.mxu1 %v645_v1  ;;  %134 = vmatpush.msra.mxu2 %v645_v1  ;;  %v668_v6 = vld [vmem:[%s928_s4 + $0x20] sm:$0xff] }
   0x5   :  { %61 = vmatpush.msra.mxu0 %v30_v4 }
   0x6   :  { %106 = vmatpush.msra.mxu1 %v655_v3  ;;  %525 = vmatmul.msk.f32.vlgmr.msra.gmra.mxu0 %vm36_vm0, %v27_v5 }
   0x7   :  { %12 = vsyncpa [#allocation3], 0  ;;  %v675_v7 = vld [vmem:[%s928_s4 + $0x18] sm:$0xff]  ;;  %135 = vmatpush.msra.mxu2 %v655_v3  ;;  %184 = vmatpush.msrb.mxu0 %v640_v0  ;;  %v683_v8 = vld [vmem:[%s928_s4 + $0x10] sm:$0xff]  ;;  %vm92_vm1 = vcmask 523264   ;;  %v89_v19 = vlaneseq  ;;  %s513_s22 = sshll.u32 %s931_s7, 4  ;;  %s514_s22 = int_to_ptr.hbm [resolvable:$true] %s513_s22 }
   0x8   :  { %107 = vmatpush.msra.mxu1 %v668_v6  ;;  %v691_v9 = vld [vmem:[%s928_s4 + $0x8] sm:$0xff]  ;;  %v699_v10 = vld [vmem:[%s928_s4] sm:$0xff]  ;;  %v737_v13 = vld [vmem:[%s929_s5 + $0x38] sm:$0xff]  ;;  %s595_s23 = smov 128  }
   0x9   :  { %136 = vmatpush.msra.mxu2 %v668_v6  ;;  %185 = vmatpush.msrb.mxu0 %v645_v1  ;;  %v91_v11 = vld [vmem:[%s925_s1] sm:$0x3]  ;;  %v28_v12 = vld [vmem:[%s924_s0 + $0x8] sm:$0xff]  ;;  %v742_v14 = vld [vmem:[%s929_s5 + $0x30] sm:$0xff]  ;;  %v90_v22 = vand.u32 127, %v89_v19  ;;  %s596_s1 = smov 8  }
   0xa   :  { %108 = vmatpush.msra.mxu1 %v675_v7  ;;  %160 = vmatpush.msra.mxu3 %v737_v13  ;;  %v749_v15 = vld [vmem:[%s929_s5 + $0x28] sm:$0xff]  ;;  %v759_v16 = vld [vmem:[%s927_s3] ss:$0 sm:$0xff]  ;;  %v29_v26 = vld [vmem:[%s924_s0 + $0x10] sm:$0x3] }
   0xb   :  { %137 = vmatpush.msra.mxu2 %v675_v7  ;;  %186 = vmatpush.msrb.mxu0 %v655_v3  ;;  %vm116_vm2 = vcmp.lt.s32.totalorder %v90_v22, 32  ;;  %v777_v25 = vld [vmem:[%s929_s5 + $0x20] sm:$0xff]  ;;  %v788_v27 = vld [vmem:[%s929_s5 + $0x18] sm:$0xff]  ;;  %v794_v28 = vld [vmem:[%s929_s5 + $0x10] sm:$0xff] }
   0xc   :  { %109 = vmatpush.msra.mxu1 %v683_v8  ;;  %161 = vmatpush.msra.mxu3 %v742_v14  ;;  %v800_v29 = vld [vmem:[%s929_s5 + $0x8] sm:$0xff]  ;;  %v807_v30 = vld [vmem:[%s929_s5] sm:$0xff] }
   0xd   :  { %138 = vmatpush.msra.mxu2 %v683_v8  ;;  %187 = vmatpush.msrb.mxu0 %v668_v6  ;;  %v854_v40 = vld [vmem:[%s930_s6] ss:$0 sm:$0xff]  ;;  %s594_s6 = smov [#allocation2]  }
   0xe   :  { %110 = vmatpush.msra.mxu1 %v691_v9  ;;  %526 = vmatmul.msk.f32.gmra.mxu0 %vm36_vm0, %v28_v12  ;;  %s511_s19 = sshll.u32 %s594_s6, 4  ;;  %s512_s19 = int_to_ptr.vmem [resolvable:$true] %s511_s19 }
   0xf   :  { %139 = vmatpush.msra.mxu2 %v691_v9  ;;  %188 = vmatpush.msrb.mxu0 %v675_v7 }
  0x10   :  { %111 = vmatpush.msra.mxu1 %v699_v10  ;;  %162 = vmatpush.msra.mxu3 %v749_v15 }
  0x11   :  { %528 = vmatmul.msk.f32.vlgmr.msra.gmra.mxu1 %vm92_vm1, %v91_v11  ;;  %140 = vmatpush.msra.mxu2 %v699_v10 }
  0x12   :  { %189 = vmatpush.msrb.mxu0 %v683_v8  ;;  %208 = vmatpush.msrb.mxu1 %v737_v13 }
  0x13   :  { %232 = vmatpush.msrb.mxu2 %v640_v0  ;;  %163 = vmatpush.msra.mxu3 %v777_v25 }
  0x14   :  { %190 = vmatpush.msrb.mxu0 %v691_v9  ;;  %209 = vmatpush.msrb.mxu1 %v742_v14 }
  0x15   :  { %233 = vmatpush.msrb.mxu2 %v645_v1  ;;  %164 = vmatpush.msra.mxu3 %v788_v27 }
  0x16   :  { %191 = vmatpush.msrb.mxu0 %v699_v10  ;;  %210 = vmatpush.msrb.mxu1 %v749_v15 }
  0x17   :  { %234 = vmatpush.msrb.mxu2 %v655_v3  ;;  %527 = vmatmul.msk.f32.gmra.mxu0 %vm36_vm0, %v29_v26 }
  0x18   :  { %278 = vmatpush.msra.mxu0 %v640_v0  ;;  %211 = vmatpush.msrb.mxu1 %v777_v25 }
  0x19   :  { %235 = vmatpush.msrb.mxu2 %v668_v6  ;;  %165 = vmatpush.msra.mxu3 %v794_v28 }
  0x1a   :  { %279 = vmatpush.msra.mxu0 %v645_v1  ;;  %212 = vmatpush.msrb.mxu1 %v788_v27 }
  0x1b   :  { %236 = vmatpush.msrb.mxu2 %v675_v7  ;;  %166 = vmatpush.msra.mxu3 %v800_v29 }
  0x1c   :  { %280 = vmatpush.msra.mxu0 %v655_v3  ;;  %213 = vmatpush.msrb.mxu1 %v794_v28 }
  0x1d   :  { %237 = vmatpush.msrb.mxu2 %v683_v8  ;;  %167 = vmatpush.msra.mxu3 %v807_v30 }
  0x1e   :  { %281 = vmatpush.msra.mxu0 %v668_v6  ;;  %214 = vmatpush.msrb.mxu1 %v800_v29 }
  0x1f   :  { %238 = vmatpush.msrb.mxu2 %v691_v9  ;;  %256 = vmatpush.msrb.mxu3 %v737_v13 }
  0x20   :  { %282 = vmatpush.msra.mxu0 %v675_v7  ;;  %215 = vmatpush.msrb.mxu1 %v807_v30 }
  0x21   :  { %239 = vmatpush.msrb.mxu2 %v699_v10  ;;  %257 = vmatpush.msrb.mxu3 %v742_v14 }
  0x22   :  { %283 = vmatpush.msra.mxu0 %v683_v8  ;;  %302 = vmatpush.msra.mxu1 %v737_v13 }
  0x23   :  { %258 = vmatpush.msrb.mxu3 %v749_v15 }
  0x24   :  { %284 = vmatpush.msra.mxu0 %v691_v9  ;;  %303 = vmatpush.msra.mxu1 %v742_v14 }
  0x25   :  { %259 = vmatpush.msrb.mxu3 %v777_v25 }
  0x26   :  { %285 = vmatpush.msra.mxu0 %v699_v10  ;;  %304 = vmatpush.msra.mxu1 %v749_v15 }
  0x27   :  { %260 = vmatpush.msrb.mxu3 %v788_v27 }
  0x28   :  { %305 = vmatpush.msra.mxu1 %v777_v25 }
  0x29   :  { %261 = vmatpush.msrb.mxu3 %v794_v28 }
  0x2a   :  { %306 = vmatpush.msra.mxu1 %v788_v27 }
  0x2b   :  { %262 = vmatpush.msrb.mxu3 %v800_v29 }
  0x2c   :  { %307 = vmatpush.msra.mxu1 %v794_v28 }
  0x2d   :  { %263 = vmatpush.msrb.mxu3 %v807_v30 }
  0x2e   :  { %308 = vmatpush.msra.mxu1 %v800_v29 }
  0x30   :  { %309 = vmatpush.msra.mxu1 %v807_v30 }
  0x83   :  { %v63_v17 = vpop.f32.mrf.mxu0 }
  0x84   :  { %v762_v18 = vadd.f32 %v759_v16, %v63_v17 }
  0x86   :  { %v120_v31 = vrot.slane %v762_v18, 2  ;;  %v174_v37 = vrot.slane %v762_v18, 4  ;;  %v222_v48 = vrot.slane %v762_v18, 6 }
  0x8b   :  { %v66_v35 = vpop.f32.mrf.mxu0 }
  0x8c   :  { %v67_v52 = vadd.f32 %v759_v16, %v66_v35 }
  0x8e   :  { %v113_v20 = vpop.f32.mrf.mxu1  ;;  %v317_v62 = vrot.slane %v67_v52, 2  ;;  %v365_v2 = vrot.slane %v67_v52, 4  ;;  %v413_v12 = vrot.slane %v67_v52, 6 }
  0x8f   :  { %v114_v21 = vadd.f32 %v113_v20, %v762_v18 }
  0x91   :  { %550 = vtanh.f32 %v114_v21 }
  0x94   :  { %v848_v36 = vpop.f32.mrf.mxu0 }
  0x95   :  { %v70_v17 = vadd.f32 %v759_v16, %v848_v36 }
  0x97   :  { %v551_v23 = vpop.eup %550 }
  0x98   :  { %v118_v24 = vsel %vm116_vm2, %v551_v23, %v91_v11 }
  0x99   :  { %529 = vmatmul.msk.f32.vlgmr.msra.gmra.mxu2 %vm92_vm1, %v118_v24 }
  0x9a   :  { %327 = vmatpush.msra.mxu2 %v640_v0 }
  0x9c   :  { %328 = vmatpush.msra.mxu2 %v645_v1 }
  0x9e   :  { %329 = vmatpush.msra.mxu2 %v655_v3 }
  0xa0   :  { %330 = vmatpush.msra.mxu2 %v668_v6 }
  0xa2   :  { %331 = vmatpush.msra.mxu2 %v675_v7 }
  0xa4   :  { %332 = vmatpush.msra.mxu2 %v683_v8 }
  0xa6   :  { %333 = vmatpush.msra.mxu2 %v691_v9 }
  0xa8   :  { %334 = vmatpush.msra.mxu2 %v699_v10 }
 0x11c   :  { %v142_v32 = vpop.f32.mrf.mxu2 }
 0x11d   :  { %v143_v33 = vadd.f32 %v142_v32, %v120_v31 }
 0x11f   :  { %552 = vtanh.f32 %v143_v33 }
 0x125   :  { %v553_v34 = vpop.eup %552 }
 0x126   :  { %530 = vmatmul.msk.f32.vlgmr.msra.gmra.mxu3 %vm92_vm1, %v553_v34  ;;  %531 = vmatmul.msk.f32.vlgmr.msrb.gmra.mxu0 %vm92_vm1, %v553_v34 }
 0x127   :  { %351 = vmatpush.msra.mxu3 %v737_v13  ;;  %375 = vmatpush.msrb.mxu0 %v640_v0 }
 0x129   :  { %352 = vmatpush.msra.mxu3 %v742_v14  ;;  %376 = vmatpush.msrb.mxu0 %v645_v1 }
 0x12b   :  { %353 = vmatpush.msra.mxu3 %v749_v15  ;;  %377 = vmatpush.msrb.mxu0 %v655_v3 }
 0x12d   :  { %354 = vmatpush.msra.mxu3 %v777_v25  ;;  %378 = vmatpush.msrb.mxu0 %v668_v6 }
 0x12f   :  { %355 = vmatpush.msra.mxu3 %v788_v27  ;;  %379 = vmatpush.msrb.mxu0 %v675_v7 }
 0x131   :  { %356 = vmatpush.msra.mxu3 %v794_v28  ;;  %380 = vmatpush.msrb.mxu0 %v683_v8 }
 0x133   :  { %357 = vmatpush.msra.mxu3 %v800_v29  ;;  %381 = vmatpush.msrb.mxu0 %v691_v9 }
 0x135   :  { %358 = vmatpush.msra.mxu3 %v807_v30  ;;  %382 = vmatpush.msrb.mxu0 %v699_v10 }
 0x1a3   :  { %v193_v38 = vpop.f32.mrf.mxu0 }
 0x1a4   :  { %v194_v39 = vadd.f32 %v193_v38, %v174_v37 }
 0x1a6   :  { %554 = vtanh.f32 %v194_v39 }
 0x1a9   :  { %v169_v41 = vpop.f32.mrf.mxu3 }
 0x1aa   :  { %v170_v42 = vadd.f32 %v854_v40, %v169_v41 }
 0x1ac   :  { %v555_v43 = vpop.eup %554  ;;  %v172_v44 = vmax.f32 %v170_v42, 0.0 }
 0x1ad   :  { %532 = vmatmul.msk.f32.vlgmr.msrb.gmra.mxu1 %vm92_vm1, %v555_v43  ;;  %533 = vmatmul.msk.f32.vlgmr.msrb.gmra.mxu2 %vm92_vm1, %v555_v43 }
 0x1ae   :  { %173 = vst [vmem:[#allocation2] sm:$0x3] %v172_v44  ;;  %399 = vmatpush.msrb.mxu1 %v737_v13  ;;  %423 = vmatpush.msrb.mxu2 %v640_v0 }
 0x1b0   :  { %400 = vmatpush.msrb.mxu1 %v742_v14  ;;  %424 = vmatpush.msrb.mxu2 %v645_v1 }
 0x1b2   :  { %401 = vmatpush.msrb.mxu1 %v749_v15  ;;  %425 = vmatpush.msrb.mxu2 %v655_v3 }
 0x1b4   :  { %402 = vmatpush.msrb.mxu1 %v777_v25  ;;  %426 = vmatpush.msrb.mxu2 %v668_v6 }
 0x1b6   :  { %403 = vmatpush.msrb.mxu1 %v788_v27  ;;  %427 = vmatpush.msrb.mxu2 %v675_v7 }
 0x1b8   :  { %404 = vmatpush.msrb.mxu1 %v794_v28  ;;  %428 = vmatpush.msrb.mxu2 %v683_v8 }
 0x1ba   :  { %405 = vmatpush.msrb.mxu1 %v800_v29  ;;  %429 = vmatpush.msrb.mxu2 %v691_v9 }
 0x1bc   :  { %406 = vmatpush.msrb.mxu1 %v807_v30  ;;  %430 = vmatpush.msrb.mxu2 %v699_v10 }
 0x22a   :  { %v217_v45 = vpop.f32.mrf.mxu1 }
 0x22b   :  { %v218_v46 = vadd.f32 %v854_v40, %v217_v45 }
 0x22d   :  { %v220_v47 = vmax.f32 %v218_v46, 0.0 }
 0x22f   :  { %221 = vst [vmem:[#allocation2 + $0x2] sm:$0x3] %v220_v47 }
 0x230   :  { %v241_v49 = vpop.f32.mrf.mxu2 }
 0x231   :  { %v242_v50 = vadd.f32 %v241_v49, %v222_v48 }
 0x233   :  { %556 = vtanh.f32 %v242_v50 }
 0x239   :  { %v557_v51 = vpop.eup %556 }
 0x23a   :  { %534 = vmatmul.msk.f32.vlgmr.msrb.gmra.mxu3 %vm92_vm1, %v557_v51  ;;  %535 = vmatmul.msk.f32.vlgmr.msra.gmra.mxu0 %vm92_vm1, %v557_v51 }
 0x23b   :  { %447 = vmatpush.msrb.mxu3 %v737_v13  ;;  %469 = vmatpush.msra.mxu0 %v640_v0 }
 0x23d   :  { %448 = vmatpush.msrb.mxu3 %v742_v14  ;;  %470 = vmatpush.msra.mxu0 %v645_v1 }
 0x23f   :  { %449 = vmatpush.msrb.mxu3 %v749_v15  ;;  %471 = vmatpush.msra.mxu0 %v655_v3 }
 0x241   :  { %450 = vmatpush.msrb.mxu3 %v777_v25  ;;  %472 = vmatpush.msra.mxu0 %v668_v6 }
 0x243   :  { %451 = vmatpush.msrb.mxu3 %v788_v27  ;;  %473 = vmatpush.msra.mxu0 %v675_v7 }
 0x245   :  { %452 = vmatpush.msrb.mxu3 %v794_v28  ;;  %474 = vmatpush.msra.mxu0 %v683_v8 }
 0x247   :  { %453 = vmatpush.msrb.mxu3 %v800_v29  ;;  %475 = vmatpush.msra.mxu0 %v691_v9 }
 0x249   :  { %454 = vmatpush.msrb.mxu3 %v807_v30  ;;  %476 = vmatpush.msra.mxu0 %v699_v10 }
 0x2b7   :  { %v287_v53 = vpop.f32.mrf.mxu0 }
 0x2b8   :  { %v288_v54 = vadd.f32 %v287_v53, %v67_v52 }
 0x2ba   :  { %558 = vtanh.f32 %v288_v54 }
 0x2bd   :  { %v265_v55 = vpop.f32.mrf.mxu3 }
 0x2be   :  { %v266_v56 = vadd.f32 %v854_v40, %v265_v55 }
 0x2c0   :  { %v559_v57 = vpop.eup %558  ;;  %v268_v58 = vmax.f32 %v266_v56, 0.0 }
 0x2c1   :  { %536 = vmatmul.msk.f32.vlgmr.msra.gmra.mxu1 %vm92_vm1, %v559_v57  ;;  %537 = vmatmul.msk.f32.vlgmr.msra.gmra.mxu2 %vm92_vm1, %v559_v57 }
 0x2c2   :  { %269 = vst [vmem:[#allocation2 + $0x4] sm:$0x3] %v268_v58  ;;  %493 = vmatpush.msra.mxu1 %v737_v13 }
 0x2c4   :  { %494 = vmatpush.msra.mxu1 %v742_v14 }
 0x2c6   :  { %495 = vmatpush.msra.mxu1 %v749_v15 }
 0x2c8   :  { %496 = vmatpush.msra.mxu1 %v777_v25 }
 0x2ca   :  { %497 = vmatpush.msra.mxu1 %v788_v27 }
 0x2cc   :  { %498 = vmatpush.msra.mxu1 %v794_v28 }
 0x2ce   :  { %499 = vmatpush.msra.mxu1 %v800_v29 }
 0x2d0   :  { %500 = vmatpush.msra.mxu1 %v807_v30 }
 0x33e   :  { %v311_v59 = vpop.f32.mrf.mxu1 }
 0x33f   :  { %v312_v60 = vadd.f32 %v854_v40, %v311_v59 }
 0x341   :  { %v314_v61 = vmax.f32 %v312_v60, 0.0 }
 0x343   :  { %315 = vst [vmem:[#allocation2 + $0x6] sm:$0x3] %v314_v61 }
 0x344   :  { %v336_v63 = vpop.f32.mrf.mxu2 }
 0x345   :  { %v337_v0 = vadd.f32 %v336_v63, %v317_v62 }
 0x347   :  { %560 = vtanh.f32 %v337_v0 }
 0x34d   :  { %v561_v1 = vpop.eup %560 }
 0x34e   :  { %538 = vmatmul.msk.f32.vlgmr.msra.gmra.mxu3 %vm92_vm1, %v561_v1  ;;  %539 = vmatmul.msk.f32.vlgmr.msrb.gmra.mxu0 %vm92_vm1, %v561_v1 }
 0x3cb   :  { %v384_v3 = vpop.f32.mrf.mxu0 }
 0x3cc   :  { %v385_v4 = vadd.f32 %v384_v3, %v365_v2 }
 0x3ce   :  { %562 = vtanh.f32 %v385_v4 }
 0x3d1   :  { %v360_v5 = vpop.f32.mrf.mxu3 }
 0x3d2   :  { %v361_v6 = vadd.f32 %v854_v40, %v360_v5 }
 0x3d4   :  { %v563_v7 = vpop.eup %562  ;;  %v363_v8 = vmax.f32 %v361_v6, 0.0 }
 0x3d5   :  { %540 = vmatmul.msk.f32.vlgmr.msrb.gmra.mxu1 %vm92_vm1, %v563_v7  ;;  %541 = vmatmul.msk.f32.vlgmr.msrb.gmra.mxu2 %vm92_vm1, %v563_v7 }
 0x3d6   :  { %364 = vst [vmem:[#allocation2 + $0x8] sm:$0x3] %v363_v8 }
 0x452   :  { %v408_v9 = vpop.f32.mrf.mxu1 }
 0x453   :  { %v409_v10 = vadd.f32 %v854_v40, %v408_v9 }
 0x455   :  { %v411_v11 = vmax.f32 %v409_v10, 0.0 }
 0x457   :  { %412 = vst [vmem:[#allocation2 + $0xa] sm:$0x3] %v411_v11 }
 0x458   :  { %v432_v13 = vpop.f32.mrf.mxu2 }
 0x459   :  { %v433_v14 = vadd.f32 %v432_v13, %v413_v12 }
 0x45b   :  { %564 = vtanh.f32 %v433_v14 }
 0x461   :  { %v565_v15 = vpop.eup %564 }
 0x462   :  { %542 = vmatmul.msk.f32.vlgmr.msrb.gmra.mxu3 %vm92_vm1, %v565_v15  ;;  %543 = vmatmul.msk.f32.vlgmr.msra.gmra.mxu0 %vm92_vm1, %v565_v15 }
 0x4df   :  { %v478_v18 = vpop.f32.mrf.mxu0 }
 0x4e0   :  { %v479_v19 = vadd.f32 %v478_v18, %v70_v17 }
 0x4e2   :  { %566 = vtanh.f32 %v479_v19 }
 0x4e5   :  { %v456_v20 = vpop.f32.mrf.mxu3 }
 0x4e6   :  { %v457_v21 = vadd.f32 %v854_v40, %v456_v20 }
 0x4e8   :  { %v567_v22 = vpop.eup %566  ;;  %v459_v23 = vmax.f32 %v457_v21, 0.0 }
 0x4e9   :  { %544 = vmatmul.msk.f32.vlgmr.msra.gmra.mxu1 %vm92_vm1, %v567_v22 }
 0x4ea   :  { %460 = vst [vmem:[#allocation2 + $0xc] sm:$0x3] %v459_v23 }
 0x566   :  { %v502_v24 = vpop.f32.mrf.mxu1 }
 0x567   :  { %v503_v16 = vadd.f32 %v854_v40, %v502_v24 }
 0x569   :  { %v505_v25 = vmax.f32 %v503_v16, 0.0 }
 0x56b   :  { %506 = vst [vmem:[#allocation2 + $0xe] sm:$0x3] %v505_v25 }
 0x56c   :  { %519 = dma.vmem_to_hbm [thread:$0]  %s512_s19, 256, %s514_s22, [#allocation3], %s595_s23, %s595_s23, %s596_s1  }
 0x56d   :  { %592 = dma.done.wait [#allocation3], 256  }
 0x56e   :  { %593 = vsyncadd [#allocation3], 4294967040 }
 0x56f   :  { %524 = vsyncpa [#allocation3], 1 }

</bundles_post_ra>
